<compile_context>
chip_gen: v6e
topology: v6e:2x2x1
jax: 0.10.0
libtpu: 0.0.40
codegen_flags: <defaults>
</compile_context>

<pallas_src>
import jax
import jax.numpy as jnp
from jax import lax
from jax.experimental import pallas as pl
from jax.experimental.pallas import tpu as pltpu


def _last_feat_kernel(ids_ref,   # SMEM [bz_pad] int32   (scalar prefetch)
                      x_ref,     # VMEM [TB, F]          text-feature tile
                      w_ref,     # VMEM [F, D]           projection weight
                      b_ref,     # VMEM [1, D]           bias
                      ebd_hbm,   # HBM  [V, D]           embedding table (pl.ANY)
                      out_ref,   # VMEM [TB, D]          output tile
                      ebd_vmem,  # VMEM scratch [TB, D]  gathered embedding rows
                      sem):      # DMA semaphores (TB,)
    tb = x_ref.shape[0]
    base = pl.program_id(0) * tb

    # Kick off one row-gather DMA per batch row of this tile (data-dependent
    # index comes from the scalar-prefetched ids in SMEM).
    @pl.loop(0, tb)
    def _(r):
        idx = ids_ref[base + r]
        pltpu.make_async_copy(ebd_hbm.at[pl.ds(idx, 1)],
                              ebd_vmem.at[pl.ds(r, 1)],
                              sem.at[r]).start()

    # MXU matmul + bias while the gather DMAs are in flight.
    acc = jnp.dot(x_ref[...], w_ref[...], preferred_element_type=jnp.float32)
    acc = acc + b_ref[...]

    # Wait for the gathered rows, fuse the embedding add, store lane-dense.
    @pl.loop(0, tb)
    def _(r):
        pltpu.make_async_copy(ebd_hbm.at[pl.ds(0, 1)],
                              ebd_vmem.at[pl.ds(r, 1)],
                              sem.at[r]).wait()

    out_ref[...] = (acc + ebd_vmem[...]).astype(out_ref.dtype)


def last_feat(text_feat, my_id, W, b, ebd_weight, *, tb=8):
    """out = text_feat @ W + b + ebd_weight[my_id]  (LastFeat.forward)."""
    bz, F = text_feat.shape
    D = W.shape[1]
    f32 = jnp.float32

    text_feat = text_feat.astype(f32)
    W = W.astype(f32)
    b2 = b.astype(f32).reshape(1, D)
    ebd_weight = ebd_weight.astype(f32)
    ids = my_id.astype(jnp.int32)

    # Pad the batch to a multiple of the tile so every block is full
    # (second-to-last block dim must be a multiple of 8).
    bz_pad = ((bz + tb - 1) // tb) * tb
    if bz_pad != bz:
        text_feat = jnp.pad(text_feat, ((0, bz_pad - bz), (0, 0)))
        ids = jnp.pad(ids, (0, bz_pad - bz))

    grid_spec = pltpu.PrefetchScalarGridSpec(
        num_scalar_prefetch=1,
        grid=(bz_pad // tb,),
        in_specs=[
            pl.BlockSpec((tb, F), lambda i, ids_r: (i, 0)),   # text_feat tile
            pl.BlockSpec((F, D), lambda i, ids_r: (0, 0)),    # W (resident)
            pl.BlockSpec((1, D), lambda i, ids_r: (0, 0)),    # bias (resident)
            pl.BlockSpec(memory_space=pl.ANY),                # embedding table in HBM
        ],
        out_specs=pl.BlockSpec((tb, D), lambda i, ids_r: (i, 0)),
        scratch_shapes=[
            pltpu.VMEM((tb, D), f32),
            pltpu.SemaphoreType.DMA((tb,)),
        ],
    )

    out = pl.pallas_call(
        _last_feat_kernel,
        out_shape=jax.ShapeDtypeStruct((bz_pad, D), f32),
        grid_spec=grid_spec,
        compiler_params=pltpu.CompilerParams(
            dimension_semantics=("parallel",)),
    )(ids, text_feat, W, b2, ebd_weight)

    return out[:bz]


def last_feat_ref(text_feat, my_id, W, b, ebd_weight):
    """Pure-JAX reference mirroring the PyTorch forward."""
    gathered = jnp.take(ebd_weight, my_id, axis=0)
    return (jnp.dot(text_feat, W, precision=lax.Precision.HIGHEST)
            + b[None, :] + gathered)


if __name__ == "__main__":
    key = jax.random.PRNGKey(0)
    bz, feat_size, latent_dim, vocab_size, padding_idx = 16, 32, 32, 64, 0
    k1, k2, k3, k4, k5 = jax.random.split(key, 5)

    text_feat = jax.random.normal(k1, (bz, feat_size), jnp.float32)
    my_id = jax.random.randint(k2, (bz,), 0, vocab_size, jnp.int32)

    bound = 0.1
    W = jax.random.uniform(k3, (feat_size, latent_dim), jnp.float32, -bound, bound)
    # Module init sets b = 0; use a small non-zero bias here so the fused
    # bias-add path is actually exercised (semantics identical for any b).
    b = jax.random.uniform(k4, (latent_dim,), jnp.float32, -bound, bound)
    ebd_weight = jax.random.uniform(k5, (vocab_size, latent_dim), jnp.float32,
                                    -bound, bound)
    # padding_idx only affects init/grad in nn.Embedding; zero the row to
    # mirror typical usage (no effect on the forward check).
    ebd_weight = ebd_weight.at[padding_idx].set(0.0)

    out = jax.block_until_ready(last_feat(text_feat, my_id, W, b, ebd_weight))

    ref = last_feat_ref(text_feat, my_id, W, b, ebd_weight)
    assert out.shape == (bz, latent_dim)
    assert jnp.allclose(out, ref, atol=1e-3, rtol=1e-3), \
        float(jnp.max(jnp.abs(out - ref)))
    print("KERNEL_OK")
</pallas_src>

<mosaic_0001>
module attributes {stable_mosaic.version = 11 : i64} {
  func.func @_last_feat_kernel(%arg0: i32, %arg1: memref<16xi32, #tpu.memory_space<smem>>, %arg2: memref<8x32xf32, #tpu.memory_space<vmem>>, %arg3: memref<32x32xf32, #tpu.memory_space<vmem>>, %arg4: memref<1x32xf32, #tpu.memory_space<vmem>>, %arg5: memref<64x32xf32, #tpu.memory_space<any>>, %arg6: memref<8x32xf32, #tpu.memory_space<vmem>>, %arg7: memref<8x32xf32, #tpu.memory_space<vmem>>, %arg8: memref<8x!tpu.dma_semaphore, #tpu.memory_space<semaphore_mem>>) attributes {dimension_semantics = [#tpu.dimension_semantics<parallel>], iteration_bounds = array<i64: 2>, scalar_prefetch = 1 : i64, scratch_operands = 2 : i64, tpu.core_type = #tpu.core_type<tc>, window_params = [{transform_indices = @transform_0, window_bounds = array<i64: 8, 32>}, {pipeline_mode = #tpu.pipeline_mode<synchronous>, transform_indices = @transform_1, window_bounds = array<i64: 32, 32>}, {pipeline_mode = #tpu.pipeline_mode<synchronous>, transform_indices = @transform_2, window_bounds = array<i64: 1, 32>}, {}, {transform_indices = @transform_4, window_bounds = array<i64: 8, 32>}]} {
    %c8_i32 = arith.constant 8 : i32
    %0 = arith.muli %arg0, %c8_i32 : i32
    %c0_i32 = arith.constant 0 : i32
    %c8_i32_0 = arith.constant 8 : i32
    %1 = arith.addi %c0_i32, %c8_i32_0 : i32
    %c1_i32 = arith.constant 1 : i32
    scf.for %arg9 = %c0_i32 to %1 step %c1_i32  : i32 {
      %c1_i32_15 = arith.constant 1 : i32
      %12 = arith.muli %arg9, %c1_i32_15 : i32
      %c0_i32_16 = arith.constant 0 : i32
      %13 = arith.addi %c0_i32_16, %12 : i32
      %14 = arith.addi %0, %13 : i32
      %15 = arith.index_cast %14 : i32 to index
      %16 = memref.load %arg1[%15] : memref<16xi32, #tpu.memory_space<smem>>
      %c0_i32_17 = arith.constant 0 : i32
      %17 = tpu.memref_slice %arg5[%16, %c0_i32_17] : memref<64x32xf32, #tpu.memory_space<any>> -> memref<1x32xf32, #tpu.memory_space<any>>
      %c0_i32_18 = arith.constant 0 : i32
      %18 = tpu.memref_slice %arg7[%13, %c0_i32_18] : memref<8x32xf32, #tpu.memory_space<vmem>> -> memref<1x32xf32, #tpu.memory_space<vmem>>
      %19 = tpu.memref_slice %arg8[%13] : memref<8x!tpu.dma_semaphore, #tpu.memory_space<semaphore_mem>> -> memref<1x!tpu.dma_semaphore, #tpu.memory_space<semaphore_mem>>
      %20 = tpu.memref_squeeze %19 : memref<1x!tpu.dma_semaphore, #tpu.memory_space<semaphore_mem>> -> memref<!tpu.dma_semaphore, #tpu.memory_space<semaphore_mem>>
      tpu.enqueue_dma source(%17 : memref<1x32xf32, #tpu.memory_space<any>>) target(%18 : memref<1x32xf32, #tpu.memory_space<vmem>>) target_semaphore(%20 : memref<!tpu.dma_semaphore, #tpu.memory_space<semaphore_mem>>)
    }
    %c8_i32_1 = arith.constant 8 : i32
    %c0 = arith.constant 0 : index
    %c0_2 = arith.constant 0 : index
    %2 = vector.load %arg2[%c0, %c0_2] : memref<8x32xf32, #tpu.memory_space<vmem>>, vector<8x32xf32>
    %c0_3 = arith.constant 0 : index
    %c0_4 = arith.constant 0 : index
    %3 = vector.load %arg3[%c0_3, %c0_4] : memref<32x32xf32, #tpu.memory_space<vmem>>, vector<32x32xf32>
    %cst = arith.constant dense<0.000000e+00> : vector<8x32xf32>
    %4 = tpu.matmul %2, %3, %cst {dimension_numbers = #tpu.dot_dimension_numbers<[1], [0], [0], [1], [0, 0, 1, 1], [], []>} : vector<8x32xf32>, vector<32x32xf32>, vector<8x32xf32> -> vector<8x32xf32>
    %c0_5 = arith.constant 0 : index
    %c0_6 = arith.constant 0 : index
    %5 = vector.load %arg4[%c0_5, %c0_6] : memref<1x32xf32, #tpu.memory_space<vmem>>, vector<1x32xf32>
    %6 = vector.broadcast %5 : vector<1x32xf32> to vector<8x32xf32>
    %7 = arith.addf %4, %6 : vector<8x32xf32>
    %c0_i32_7 = arith.constant 0 : i32
    %c8_i32_8 = arith.constant 8 : i32
    %8 = arith.addi %c0_i32_7, %c8_i32_8 : i32
    %c1_i32_9 = arith.constant 1 : i32
    scf.for %arg9 = %c0_i32_7 to %8 step %c1_i32_9  : i32 {
      %c1_i32_15 = arith.constant 1 : i32
      %12 = arith.muli %arg9, %c1_i32_15 : i32
      %c0_i32_16 = arith.constant 0 : i32
      %13 = arith.addi %c0_i32_16, %12 : i32
      %c0_i32_17 = arith.constant 0 : i32
      %c0_i32_18 = arith.constant 0 : i32
      %14 = tpu.memref_slice %arg5[%c0_i32_17, %c0_i32_18] : memref<64x32xf32, #tpu.memory_space<any>> -> memref<1x32xf32, #tpu.memory_space<any>>
      %c0_i32_19 = arith.constant 0 : i32
      %15 = tpu.memref_slice %arg7[%13, %c0_i32_19] : memref<8x32xf32, #tpu.memory_space<vmem>> -> memref<1x32xf32, #tpu.memory_space<vmem>>
      %16 = tpu.memref_slice %arg8[%13] : memref<8x!tpu.dma_semaphore, #tpu.memory_space<semaphore_mem>> -> memref<1x!tpu.dma_semaphore, #tpu.memory_space<semaphore_mem>>
      %17 = tpu.memref_squeeze %16 : memref<1x!tpu.dma_semaphore, #tpu.memory_space<semaphore_mem>> -> memref<!tpu.dma_semaphore, #tpu.memory_space<semaphore_mem>>
      tpu.wait_dma2 semaphore(%17 : memref<!tpu.dma_semaphore, #tpu.memory_space<semaphore_mem>>) src(%14 : memref<1x32xf32, #tpu.memory_space<any>>) dst(%15 : memref<1x32xf32, #tpu.memory_space<vmem>>)
    }
    %c8_i32_10 = arith.constant 8 : i32
    %c0_11 = arith.constant 0 : index
    %c0_12 = arith.constant 0 : index
    %9 = vector.load %arg7[%c0_11, %c0_12] : memref<8x32xf32, #tpu.memory_space<vmem>>, vector<8x32xf32>
    %10 = arith.addf %7, %9 : vector<8x32xf32>
    %c0_13 = arith.constant 0 : index
    %c0_14 = arith.constant 0 : index
    %11 = vector.load %arg6[%c0_13, %c0_14] : memref<8x32xf32, #tpu.memory_space<vmem>>, vector<8x32xf32>
    tpu.vector_store %arg6[%c0_13, %c0_14], %10 {strides = array<i32>} : memref<8x32xf32, #tpu.memory_space<vmem>>, vector<8x32xf32>,
    return
  }
  func.func @transform_0(%arg0: i32, %arg1: memref<16xi32, #tpu.memory_space<smem>>) -> (i32, i32) {
    %c0_i32 = arith.constant 0 : i32
    %c0_i32_0 = arith.constant 0 : i32
    return %arg0, %c0_i32 : i32, i32
  }
  func.func @transform_1(%arg0: i32, %arg1: memref<16xi32, #tpu.memory_space<smem>>) -> (i32, i32) {
    %c0_i32 = arith.constant 0 : i32
    %c0_i32_0 = arith.constant 0 : i32
    %c0_i32_1 = arith.constant 0 : i32
    return %c0_i32, %c0_i32_0 : i32, i32
  }
  func.func @transform_2(%arg0: i32, %arg1: memref<16xi32, #tpu.memory_space<smem>>) -> (i32, i32) {
    %c0_i32 = arith.constant 0 : i32
    %c0_i32_0 = arith.constant 0 : i32
    %c0_i32_1 = arith.constant 0 : i32
    return %c0_i32, %c0_i32_0 : i32, i32
  }
  func.func @transform_4(%arg0: i32, %arg1: memref<16xi32, #tpu.memory_space<smem>>) -> (i32, i32) {
    %c0_i32 = arith.constant 0 : i32
    %c0_i32_0 = arith.constant 0 : i32
    return %arg0, %c0_i32 : i32, i32
  }
}

</mosaic_0001>

<bundles_post_ra>
// kernel: tpu_custom_call.1
= control target key start
LH: loop header
LB: loop body
LE: loop exit
PB: predicated region body
PF: predicated region fallthrough
CT: control target
= control target key end

     0   :  { %s837_s0 = inlined_call_operand.vmem [shape: s32[16], index: 0, kind: input, shape index: {}]   ;;  %s838_s1 = inlined_call_operand.vmem [shape: f32[16,32], index: 1, kind: input, shape index: {}]   ;;  %s839_s2 = inlined_call_operand.vmem [shape: f32[32,32], index: 2, kind: input, shape index: {}]   ;;  %s840_s3 = inlined_call_operand.vmem [shape: f32[1,32], index: 3, kind: input, shape index: {}]   ;;  %s841_s4 = inlined_call_operand.vmem [shape: f32[64,32], index: 4, kind: input, shape index: {}]   ;;  %s842_s5 = inlined_call_operand.hbm [shape: f32[16,32], index: 5, kind: output, shape index: {}]  }
   0x1   :  { %s10_s20 = sshll.u32 %s837_s0, 4  ;;  %s11_s20 = int_to_ptr.vmem [resolvable:$true] %s10_s20 }
   0x2   :  { %s578_s21 = scalar_lea.vmem %s11_s20, 16  ;;  %p583_p1 = scmp.lt.s32.totalorder %s11_s20, %s11_s20 }
   0x3   :  { %p579_p0 = scmp.ne.s32.totalorder %s11_s20, %s578_s21  ;;  %p584_p2 = scmp.lt.s32.totalorder %s578_s21, %s578_s21 }
   0x5   :  { %p585_p3 = por %p584_p2, %p583_p1 }
   0x7   :  { %p586_p4 = pnand %p585_p3, %p579_p0 }
   0x9   :  { %589 = shalt.err (!%p586_p4)  }
   0xa   :  { %s672_s22 = smov [#allocation5]  }
   0xb   :  { %13 = dma.vmem_to_smem %s11_s20, 16, %s672_s22, [#allocation4] }
   0xc   :  { %640 = dma.done.wait [#allocation4], 16 }
   0xd   :  { %641 = vsyncadd [#allocation4], 4294967280 }
   0xe   :  { %15 = sfence }
   0xf   :  { %16 = vsyncpa [#allocation7], 0 }
  0x10   :  { %18 = vsyncpa [#allocation7 + $0x1], 0  ;;  %s709_s23 = smov 0   ;;  %s711_s24 = smov 0  }
  0x11   :  { %s713_s0 = smov 0   ;;  %s715_s25 = smov 0  }
  0x12 LB: > { %s730_s26 = sadd.s32 4294967295, %s662_s25   ;;  %s483_s27 = sadd.s32 4294967294, %s662_s25   ;;  %s662_s25 = sphi %s715_s25, %s848_s25   ;;  %s658_s0 = sphi %s713_s0, %s847_s0   ;;  %s654_s24 = sphi %s711_s24, %s846_s24   ;;  %s650_s23 = sphi %s709_s23, %s845_s23  }
  0x13   : > { %s734_s28 = sadd.s32 1, %s662_s25   ;;  %s99_s29 = sadd.s32 1, %s658_s0 }
  0x14   : > { %s96_s30 = ssub.s32 %s662_s25, %s734_s28  ;;  %p109_p5 = scmp.ne.s32.totalorder %s658_s0, %s654_s24 }
  0x15   : > { %p97_p6 = scmp.eq.s32.totalorder %s96_s30, 0  ;;  %p110_p7 = scmp.eq.s32.totalorder %s730_s26, 1 }
  0x16   : > { %p115_p8 = scmp.ne.s32.totalorder %s654_s24, %s650_s23  ;;  %p116_p9 = scmp.eq.s32.totalorder %s483_s27, 1 }
  0x17   : > { %s745_s6 = scalar_select %p97_p6, %s658_s0, %s99_s29  }
  0x18   : > { %p747_p10 = por %p110_p7, %p109_p5  ;;  %p751_p11 = por %p116_p9, %p115_p8 }
  0x19   : > { %p486_p12 = scmp.ge.s32.totalorder %s662_s25, 1  ;;  %p147_p13 = scmp.lt.s32.totalorder %s662_s25, 3 }
  0x1b   : > { %p148_p0 = pnand %p486_p12, %p147_p13 }
  0x1c   : > { %s167_s9 = sand.u32 (!%p148_p0), 1, %s654_s24   ;;  %p170_p1 = scmp.lt.s32.totalorder (!%p148_p0), %s730_s26, 1 }
  0x1d   : > { %151 = sbr.rel (%p148_p0) target bundleno = 282 (0x11a), region = 32  ;;  %s761_s10 = sshll.u32 (!%p148_p0), %s167_s9, 3 }
  0x1e   : > { %s489_s11 = sshll.u32 (!%p148_p0), %s730_s26, 3  ;;  %s169_s17 = scalar_lea.vmem (!%p148_p0), [#allocation6], %s761_s10 }
  0x1f   : > { %s664_s18 = smov (!%p148_p0), 0  }
  0x22   : > { %s171_s12 = scalar_select %p170_p1, %s730_s26, 1 }
  0x24   : > { %s488_s13 = sshll.u32 %s171_s12, 3 }
  0x25   : > { %s768_s16 = scalar_lea.vmem %s838_s1, %s488_s13 }
  0x26 LB: >> { %s181_s19 = sadd.s32 %s666_s18, %s489_s11  ;;  %s184_s29 = scalar_lea.vmem [#allocation2], %s666_s18  ;;  %s666_s18 = sphi %s664_s18, %s180_s18  }
  0x27   : >> { %s182_s20 = sld [smem:[#allocation5 + %s181_s19]]  ;;  %s185_s30 = scalar_lea.sflag [#allocation3], %s666_s18 }
  0x2d   : >> { %s183_s27 = scalar_lea.vmem %s841_s4, %s182_s20 }
  0x2e   : >> { %v204_v0 = vld [vmem:[%s183_s27] sm:$0x1] }
  0x2f   : >> { %205 = vst [vmem:[%s184_s29] sm:$0x1] %v204_v0 }
  0x30   : >> { %231 = vsyncadd %s185_s30, 16  ;;  %s180_s18 = sadd.s32 1, %s666_s18  }
  0x31   : >> { %p177_p2 = scmp.ge.s32.totalorder %s180_s18, 8  }
  0x32   : > { %v236_v1 = vld [vmem:[%s839_s2 + $0x18] sm:$0xff] (%p177_p2)  ;;  %v673_v2 = vmov (%p177_p2), 0.0   ;;  %v235_v3 = vld [vmem:[%s839_s2 + $0x10] sm:$0xff] (%p177_p2)  ;;  %vm674_vm0 = vmmov (%p177_p2), 0   ;;  %v234_v4 = vld [vmem:[%s839_s2 + $0x8] sm:$0xff] (%p177_p2)  ;;  %vm244_vm1 = vcmask (%p177_p2), 261120  }
  0x33   : > { %179 = sbr.rel (!%p177_p2) target bundleno = 38 (0x26), region = 132  ;;  %509 = vmatprep.subr.mxu0 (%p177_p2), %v673_v2  ;;  %517 = vmatprep.mubr.msk.f32.mxu0 (%p177_p2), %vm674_vm0, %v673_v2  ;;  %v233_v5 = vld [vmem:[%s839_s2] sm:$0xff] (%p177_p2)  ;;  %s668_s27 = smov (%p177_p2), 0  }
  0x34   : > { %510 = vmatpush3.msra.mxu0 (%p177_p2), %v236_v1  ;;  %v232_v6 = vld [vmem:[%s768_s16] sm:$0xff] (%p177_p2) }
  0x35   : > { %511 = vmatprep.subr.mxu0 (%p177_p2), %v673_v2  ;;  %v490_v7 = vld [vmem:[%s840_s3] ss:$0 sm:$0xff] (%p177_p2) }
  0x36   : > { %512 = vmatpush3.msra.mxu0 (%p177_p2), %v235_v3 }
  0x37   : > { %513 = vmatprep.subr.mxu0 (%p177_p2), %v673_v2 }
  0x38   : > { %514 = vmatpush3.msra.mxu0 %v234_v4 }
  0x39   : > { %515 = vmatprep.subr.mxu0 %v673_v2 }
  0x3a   : > { %516 = vmatpush3.msra.mxu0 %v233_v5 }
  0x3b   : > { %518 = vmatmul.mubr.msk.f32.vlgmr.msra.gmra.mxu0 %vm244_vm1, %v232_v6 }
  0xfb   : > { %v314_v8 = vpop.f32.mrf.mxu0 }
  0xfc   : > { %v315_v9 = vadd.f32 %v490_v7, %v314_v8 }
  0xfd   : > { %v519_v10 = vpop.f32.mrf.mxu0 }
  0xfe LB: >> { %s324_s29 = scalar_lea.sflag [#allocation3], %s670_s27  ;;  %s670_s27 = sphi %s668_s27, %s323_s27  }
  0xff   : >> { %642 = dma.done.wait %s324_s29, 16 }
 0x100   : >> { %643 = vsyncadd %s324_s29, 4294967280  ;;  %s323_s27 = sadd.s32 1, %s670_s27  }
 0x101   : >> { %p320_p3 = scmp.ge.s32.totalorder %s323_s27, 8  }
 0x102   : > { %v328_v11 = vld [vmem:[#allocation2] sm:$0xff] (%p320_p3)  ;;  %s493_s16 = sshll.u32 (%p320_p3), %s730_s26, 7  ;;  %s345_s14 = sshll.u32 (%p320_p3), %s169_s17, 4  ;;  %s346_s14 = int_to_ptr.vmem [resolvable:$true] %s345_s14 }
 0x103   : > { %322 = sbr.rel (!%p320_p3) target bundleno = 254 (0xfe), region = 143  ;;  %v329_v12 = vadd.f32 (%p320_p3), %v328_v11, %v315_v9  ;;  %s795_s13 = scalar_lea.hbm (%p320_p3), %s842_s5, %s493_s16 }
 0x104   : > { %s332_s15 = scalar_lea.sflag (%p320_p3), [#allocation7], %s167_s9  ;;  %s590_s19 = scalar_lea.vmem (%p320_p3), %s346_s14, 128 }
 0x105   : > { %330 = vst.msk [vmem:[%s169_s17] sm:$0xff] (%p320_p3), %vm244_vm1, %v329_v12  ;;  %p591_p4 = scmp.ne.s32.totalorder (%p320_p3), %s346_s14, %s590_s19  ;;  %s675_s26 = smov (%p320_p3), [#allocation6]  }
 0x106   : > { %s594_s20 = sshll.u32 (%p320_p3), %s675_s26, 4  ;;  %s595_s20 = int_to_ptr.vmem [resolvable:$false] %s594_s20 }
 0x107   : > { %p592_p5 = pnand (%p320_p3), %p591_p4, %p747_p10  ;;  %s596_s11 = scalar_lea.vmem (%p320_p3), %s595_s20, 256 }
 0x108   : > { %p597_p7 = scmp.lt.s32.totalorder %s346_s14, %s595_s20  ;;  %p598_p8 = scmp.lt.s32.totalorder %s596_s11, %s590_s19 }
 0x109   : > { %p593_p6 = pneg %p592_p5 }
 0x10a   : > { %p599_p9 = por %p598_p8, %p597_p7 }
 0x10c   : > { %p600_p12 = pnand %p599_p9, %p593_p6 }
 0x10e   : > { %603 = shalt.err (!%p600_p12)
}
 0x10f   : > { %s604_s10 = scalar_lea.hbm %s795_s13, 128  ;;  %s608_s18 = scalar_lea.hbm %s842_s5, 256 }
 0x110   : > { %p605_p13 = scmp.ne.s32.totalorder %s795_s13, %s604_s10  ;;  %p609_p2 = scmp.lt.s32.totalorder %s795_s13, %s842_s5 }
 0x111   : > { %p610_p3 = scmp.lt.s32.totalorder %s608_s18, %s604_s10 }
 0x112   : > { %p606_p0 = pnand %p605_p13, %p747_p10 }
 0x113   : > { %p611_p4 = por %p610_p3, %p609_p2 }
 0x114   : > { %p607_p1 = pneg %p606_p0 }
 0x116   : > { %p612_p5 = pnand %p611_p4, %p607_p1 }
 0x118   : > { %615 = shalt.err (!%p612_p5)
}
 0x119   : > { %520 = dma.vmem_to_hbm [thread:$0]  (%p747_p10), %s346_s14, 128, %s795_s13, %s332_s15  }
 0x11a PF: > { %p526_p6 = scmp.ge.s32.totalorder %s662_s25, 2  ;;  %s357_s27 = sand.u32 1, %s650_s23  }
 0x11b   : > { %s358_s29 = scalar_lea.sflag [#allocation7], %s357_s27 }
 0x11c   : > { %p523_p7 = pnand %p526_p6, %p751_p11 }
 0x11e   : > { %p524_p8 = pneg %p523_p7 }
 0x120   : > { %645 = dma.done.wait (%p524_p8), %s358_s29, 128  }
 0x121   : > { %647 = vsyncadd (%p524_p8), %s358_s29, 4294967168  ;;  %p21_p9 = scmp.ge.s32.totalorder %s734_s28, 4   ;;  %s845_s23 = smov %s654_s24 }
 0x122   : > { %s846_s24 = smov %s658_s0  ;;  %s847_s0 = smov %s745_s6 }
 0x123   : > { %s848_s25 = smov %s734_s28  ;;  %23 = sbr.rel (!%p21_p9) target bundleno = 18 (0x12), region = 154 }
 0x128   :  { %363 = vsyncpa [#allocation7], 1 }
 0x129   :  { %365 = vsyncpa [#allocation7 + $0x1], 1 }
 0x12a   :  { %366 = vsyncmov [#allocation3] }
 0x12d   :  { %s367_s25 = vpop.sfrf %366 }
 0x12e   :  { %p496_p10 = scmp.ne.s32.totalorder %s367_s25, 0 }
 0x130   :  { %371 = shalt.err (%p496_p10)  }
 0x131   :  { %373 = vsyncmov [#allocation3 + $0x1] }
 0x134   :  { %s374_s7 = vpop.sfrf %373 }
 0x135   :  { %p497_p11 = scmp.ne.s32.totalorder %s374_s7, 0 }
 0x137   :  { %378 = shalt.err (%p497_p11)  }
 0x138   :  { %380 = vsyncmov [#allocation3 + $0x2] }
 0x13b   :  { %s381_s8 = vpop.sfrf %380 }
 0x13c   :  { %p498_p12 = scmp.ne.s32.totalorder %s381_s8, 0 }
 0x13e   :  { %385 = shalt.err (%p498_p12)  }
 0x13f   :  { %387 = vsyncmov [#allocation3 + $0x3] }
 0x142   :  { %s388_s16 = vpop.sfrf %387 }
 0x143   :  { %p499_p13 = scmp.ne.s32.totalorder %s388_s16, 0 }
 0x145   :  { %392 = shalt.err (%p499_p13)  }
 0x146   :  { %394 = vsyncmov [#allocation3 + $0x4] }
 0x149   :  { %s395_s28 = vpop.sfrf %394 }
 0x14a   :  { %p500_p0 = scmp.ne.s32.totalorder %s395_s28, 0 }
 0x14c   :  { %399 = shalt.err (%p500_p0)  }
 0x14d   :  { %401 = vsyncmov [#allocation3 + $0x5] }
 0x150   :  { %s402_s1 = vpop.sfrf %401 }
 0x151   :  { %p501_p1 = scmp.ne.s32.totalorder %s402_s1, 0 }
 0x153   :  { %406 = shalt.err (%p501_p1)  }
 0x154   :  { %408 = vsyncmov [#allocation3 + $0x6] }
 0x157   :  { %s409_s2 = vpop.sfrf %408 }
 0x158   :  { %p502_p2 = scmp.ne.s32.totalorder %s409_s2, 0 }
 0x15a   :  { %413 = shalt.err (%p502_p2)  }
 0x15b   :  { %415 = vsyncmov [#allocation3 + $0x7] }
 0x15e   :  { %s416_s3 = vpop.sfrf %415 }
 0x15f   :  { %p503_p3 = scmp.ne.s32.totalorder %s416_s3, 0 }
 0x161   :  { %420 = shalt.err (%p503_p3)  }

</bundles_post_ra>
